<compile_context>
chip_gen: v7x
topology: tpu7x:2x2x1
jax: 0.10.0
libtpu: 0.0.40
codegen_flags: <defaults>
</compile_context>

<pallas_src>
import jax
import jax.numpy as jnp
from jax.experimental import pallas as pl
from jax.experimental.pallas import tpu as pltpu


# ---------------------------------------------------------------------------
# Plain-JAX setup helpers (mirror the torch module's __init__)
# ---------------------------------------------------------------------------
def rotate_half_vec(x):
    # x: (..., dim) -> split into halves (j=2), return cat(-x2, x1)
    d2 = x.shape[-1] // 2
    x1, x2 = x[..., :d2], x[..., d2:]
    return jnp.concatenate([-x2, x1], axis=-1)


def get_rotary_embedding(dim, max_seq_len, base):
    assert dim % 2 == 0
    positions = jnp.arange(max_seq_len, dtype=jnp.float32)
    freqs = jnp.power(jnp.float32(base),
                      jnp.arange(0, dim, 2, dtype=jnp.float32) / (-dim))
    angles = positions[:, None] * freqs[None, :]          # (max_seq_len, dim//2)
    return jnp.concatenate([angles, angles], axis=-1)     # (max_seq_len, dim)


def precompute_rot_table(vec, rotary_embedding):
    # row p = apply_rotary_pos_emb(vec, rotary_embedding[p])  -> (L, dim)
    return (vec[None, :] * jnp.cos(rotary_embedding)
            + rotate_half_vec(vec)[None, :] * jnp.sin(rotary_embedding))


# ---------------------------------------------------------------------------
# Pallas kernel: gather pre-rotated rows by m/n, one multiply, one reduce
# ---------------------------------------------------------------------------
def rope_dot_kernel(m_ref, n_ref, a_tab_ref, b_tab_ref, o_ref, a_rows, b_rows):
    # m_ref / n_ref       : SMEM int32 (B,) position indices (scalar prefetch)
    # a_tab_ref/b_tab_ref : VMEM (L, 1, dim) precomputed rotated-vector tables
    # o_ref               : VMEM (B, 1) output
    # a_rows / b_rows     : VMEM (B, dim) scratch for the gathered rows
    B = o_ref.shape[0]

    # Dynamic leading-axis row gather into scratch (static sublane stores).
    for bi in range(B):                       # static unroll; B is small
        a_rows[pl.ds(bi, 1), :] = a_tab_ref[m_ref[bi]]
        b_rows[pl.ds(bi, 1), :] = b_tab_ref[n_ref[bi]]

    # Single vectorized multiply + single lane reduce + single store.
    o_ref[...] = jnp.sum(a_rows[...] * b_rows[...], axis=-1, keepdims=True)


# ---------------------------------------------------------------------------
# Wrapper: all rotation math hoisted to setup (closure over parameters)
# ---------------------------------------------------------------------------
def make_vector_rope_forward(a, b, rotary_embedding):
    dim = a.shape[0]
    max_seq_len = rotary_embedding.shape[0]

    # Computed ONCE: fully rotated tables.  No per-call transcendentals, no
    # per-call rotation math, no per-call HBM gathers of (B, dim) slabs.
    a_rot_table = precompute_rot_table(a.astype(jnp.float32),
                                       rotary_embedding.astype(jnp.float32))
    b_rot_table = precompute_rot_table(b.astype(jnp.float32),
                                       rotary_embedding.astype(jnp.float32))
    a_rot_table = a_rot_table.reshape(max_seq_len, 1, dim)
    b_rot_table = b_rot_table.reshape(max_seq_len, 1, dim)

    @jax.jit
    def forward(m, n):
        B = m.shape[0]
        grid_spec = pltpu.PrefetchScalarGridSpec(
            num_scalar_prefetch=2,            # m, n land in SMEM
            grid=(1,),
            in_specs=[
                pl.BlockSpec((max_seq_len, 1, dim), lambda i, m_r, n_r: (0, 0, 0)),
                pl.BlockSpec((max_seq_len, 1, dim), lambda i, m_r, n_r: (0, 0, 0)),
            ],
            out_specs=pl.BlockSpec((B, 1), lambda i, m_r, n_r: (0, 0)),
            scratch_shapes=[
                pltpu.VMEM((B, dim), jnp.float32),   # gathered a rows
                pltpu.VMEM((B, dim), jnp.float32),   # gathered b rows
            ],
        )
        out = pl.pallas_call(
            rope_dot_kernel,
            out_shape=jax.ShapeDtypeStruct((B, 1), jnp.float32),
            grid_spec=grid_spec,
            compiler_params=pltpu.CompilerParams(
                dimension_semantics=("arbitrary",)),
        )(m.astype(jnp.int32), n.astype(jnp.int32), a_rot_table, b_rot_table)
        return out[:, 0]                      # (B,)

    return forward


# ---------------------------------------------------------------------------
# Pure-JAX reference (correctness check)
# ---------------------------------------------------------------------------
def reference_forward(m, n, a, b, rotary_embedding):
    def apply_rope(x, emb):
        return x * jnp.cos(emb) + rotate_half_vec(x) * jnp.sin(emb)
    a_rot = apply_rope(a, rotary_embedding[m])   # (B, dim)
    b_rot = apply_rope(b, rotary_embedding[n])   # (B, dim)
    return jnp.einsum('bi,bi->b', a_rot, b_rot)


if __name__ == "__main__":
    dim = 32
    max_seq_len = 16
    base = 10000.0
    B = 8

    key = jax.random.PRNGKey(0)
    k_a, k_b, k_m, k_n = jax.random.split(key, 4)

    # Module parameters (nn.Parameter(torch.randn(dim))) and rotary table
    a_param = jax.random.normal(k_a, (dim,), dtype=jnp.float32)
    b_param = jax.random.normal(k_b, (dim,), dtype=jnp.float32)
    rotary_embedding = get_rotary_embedding(dim, max_seq_len, base)

    # Position index inputs m, n of shape (B,)
    m = jax.random.randint(k_m, (B,), 0, max_seq_len, dtype=jnp.int32)
    n = jax.random.randint(k_n, (B,), 0, max_seq_len, dtype=jnp.int32)

    forward = make_vector_rope_forward(a_param, b_param, rotary_embedding)

    out = forward(m, n)
    out = jax.block_until_ready(out)

    ref = reference_forward(m, n, a_param, b_param, rotary_embedding)
    assert out.shape == (B,)
    assert jnp.allclose(out, ref, atol=1e-4, rtol=1e-4), (out, ref)

    print("KERNEL_OK")
</pallas_src>

<mosaic_0001>
module attributes {stable_mosaic.version = 11 : i64} {
  func.func @rope_dot_kernel(%arg0: i32, %arg1: memref<8xi32, #tpu.memory_space<smem>>, %arg2: memref<8xi32, #tpu.memory_space<smem>>, %arg3: memref<16x1x32xf32, #tpu.memory_space<vmem>>, %arg4: memref<16x1x32xf32, #tpu.memory_space<vmem>>, %arg5: memref<8x1xf32, #tpu.memory_space<vmem>>, %arg6: memref<8x32xf32, #tpu.memory_space<vmem>>, %arg7: memref<8x32xf32, #tpu.memory_space<vmem>>) attributes {dimension_semantics = [#tpu.dimension_semantics<arbitrary>], iteration_bounds = array<i64: 1>, scalar_prefetch = 2 : i64, scratch_operands = 2 : i64, tpu.core_type = #tpu.core_type<tc>, window_params = [{pipeline_mode = #tpu.pipeline_mode<synchronous>, transform_indices = @transform_0, window_bounds = array<i64: 16, 1, 32>}, {pipeline_mode = #tpu.pipeline_mode<synchronous>, transform_indices = @transform_1, window_bounds = array<i64: 16, 1, 32>}, {pipeline_mode = #tpu.pipeline_mode<synchronous>, transform_indices = @transform_2, window_bounds = array<i64: 8, 1>}]} {
    %c0 = arith.constant 0 : index
    %0 = memref.load %arg1[%c0] : memref<8xi32, #tpu.memory_space<smem>>
    %1 = arith.index_cast %0 : i32 to index
    %c0_0 = arith.constant 0 : index
    %c0_1 = arith.constant 0 : index
    %2 = vector.load %arg3[%1, %c0_0, %c0_1] : memref<16x1x32xf32, #tpu.memory_space<vmem>>, vector<1x1x32xf32>
    %3 = vector.shape_cast %2 : vector<1x1x32xf32> to vector<1x32xf32>
    %c0_2 = arith.constant 0 : index
    %c0_3 = arith.constant 0 : index
    %4 = vector.load %arg6[%c0_2, %c0_3] : memref<8x32xf32, #tpu.memory_space<vmem>>, vector<1x32xf32>
    tpu.vector_store %arg6[%c0_2, %c0_3], %3 {strides = array<i32>} : memref<8x32xf32, #tpu.memory_space<vmem>>, vector<1x32xf32>,
    %c0_4 = arith.constant 0 : index
    %5 = memref.load %arg2[%c0_4] : memref<8xi32, #tpu.memory_space<smem>>
    %6 = arith.index_cast %5 : i32 to index
    %c0_5 = arith.constant 0 : index
    %c0_6 = arith.constant 0 : index
    %7 = vector.load %arg4[%6, %c0_5, %c0_6] : memref<16x1x32xf32, #tpu.memory_space<vmem>>, vector<1x1x32xf32>
    %8 = vector.shape_cast %7 : vector<1x1x32xf32> to vector<1x32xf32>
    %c0_7 = arith.constant 0 : index
    %c0_8 = arith.constant 0 : index
    %9 = vector.load %arg7[%c0_7, %c0_8] : memref<8x32xf32, #tpu.memory_space<vmem>>, vector<1x32xf32>
    tpu.vector_store %arg7[%c0_7, %c0_8], %8 {strides = array<i32>} : memref<8x32xf32, #tpu.memory_space<vmem>>, vector<1x32xf32>,
    %c1 = arith.constant 1 : index
    %10 = memref.load %arg1[%c1] : memref<8xi32, #tpu.memory_space<smem>>
    %11 = arith.index_cast %10 : i32 to index
    %c0_9 = arith.constant 0 : index
    %c0_10 = arith.constant 0 : index
    %12 = vector.load %arg3[%11, %c0_9, %c0_10] : memref<16x1x32xf32, #tpu.memory_space<vmem>>, vector<1x1x32xf32>
    %13 = vector.shape_cast %12 : vector<1x1x32xf32> to vector<1x32xf32>
    %c1_11 = arith.constant 1 : index
    %c0_12 = arith.constant 0 : index
    %14 = vector.load %arg6[%c1_11, %c0_12] : memref<8x32xf32, #tpu.memory_space<vmem>>, vector<1x32xf32>
    tpu.vector_store %arg6[%c1_11, %c0_12], %13 {strides = array<i32>} : memref<8x32xf32, #tpu.memory_space<vmem>>, vector<1x32xf32>,
    %c1_13 = arith.constant 1 : index
    %15 = memref.load %arg2[%c1_13] : memref<8xi32, #tpu.memory_space<smem>>
    %16 = arith.index_cast %15 : i32 to index
    %c0_14 = arith.constant 0 : index
    %c0_15 = arith.constant 0 : index
    %17 = vector.load %arg4[%16, %c0_14, %c0_15] : memref<16x1x32xf32, #tpu.memory_space<vmem>>, vector<1x1x32xf32>
    %18 = vector.shape_cast %17 : vector<1x1x32xf32> to vector<1x32xf32>
    %c1_16 = arith.constant 1 : index
    %c0_17 = arith.constant 0 : index
    %19 = vector.load %arg7[%c1_16, %c0_17] : memref<8x32xf32, #tpu.memory_space<vmem>>, vector<1x32xf32>
    tpu.vector_store %arg7[%c1_16, %c0_17], %18 {strides = array<i32>} : memref<8x32xf32, #tpu.memory_space<vmem>>, vector<1x32xf32>,
    %c2 = arith.constant 2 : index
    %20 = memref.load %arg1[%c2] : memref<8xi32, #tpu.memory_space<smem>>
    %21 = arith.index_cast %20 : i32 to index
    %c0_18 = arith.constant 0 : index
    %c0_19 = arith.constant 0 : index
    %22 = vector.load %arg3[%21, %c0_18, %c0_19] : memref<16x1x32xf32, #tpu.memory_space<vmem>>, vector<1x1x32xf32>
    %23 = vector.shape_cast %22 : vector<1x1x32xf32> to vector<1x32xf32>
    %c2_20 = arith.constant 2 : index
    %c0_21 = arith.constant 0 : index
    %24 = vector.load %arg6[%c2_20, %c0_21] : memref<8x32xf32, #tpu.memory_space<vmem>>, vector<1x32xf32>
    tpu.vector_store %arg6[%c2_20, %c0_21], %23 {strides = array<i32>} : memref<8x32xf32, #tpu.memory_space<vmem>>, vector<1x32xf32>,
    %c2_22 = arith.constant 2 : index
    %25 = memref.load %arg2[%c2_22] : memref<8xi32, #tpu.memory_space<smem>>
    %26 = arith.index_cast %25 : i32 to index
    %c0_23 = arith.constant 0 : index
    %c0_24 = arith.constant 0 : index
    %27 = vector.load %arg4[%26, %c0_23, %c0_24] : memref<16x1x32xf32, #tpu.memory_space<vmem>>, vector<1x1x32xf32>
    %28 = vector.shape_cast %27 : vector<1x1x32xf32> to vector<1x32xf32>
    %c2_25 = arith.constant 2 : index
    %c0_26 = arith.constant 0 : index
    %29 = vector.load %arg7[%c2_25, %c0_26] : memref<8x32xf32, #tpu.memory_space<vmem>>, vector<1x32xf32>
    tpu.vector_store %arg7[%c2_25, %c0_26], %28 {strides = array<i32>} : memref<8x32xf32, #tpu.memory_space<vmem>>, vector<1x32xf32>,
    %c3 = arith.constant 3 : index
    %30 = memref.load %arg1[%c3] : memref<8xi32, #tpu.memory_space<smem>>
    %31 = arith.index_cast %30 : i32 to index
    %c0_27 = arith.constant 0 : index
    %c0_28 = arith.constant 0 : index
    %32 = vector.load %arg3[%31, %c0_27, %c0_28] : memref<16x1x32xf32, #tpu.memory_space<vmem>>, vector<1x1x32xf32>
    %33 = vector.shape_cast %32 : vector<1x1x32xf32> to vector<1x32xf32>
    %c3_29 = arith.constant 3 : index
    %c0_30 = arith.constant 0 : index
    %34 = vector.load %arg6[%c3_29, %c0_30] : memref<8x32xf32, #tpu.memory_space<vmem>>, vector<1x32xf32>
    tpu.vector_store %arg6[%c3_29, %c0_30], %33 {strides = array<i32>} : memref<8x32xf32, #tpu.memory_space<vmem>>, vector<1x32xf32>,
    %c3_31 = arith.constant 3 : index
    %35 = memref.load %arg2[%c3_31] : memref<8xi32, #tpu.memory_space<smem>>
    %36 = arith.index_cast %35 : i32 to index
    %c0_32 = arith.constant 0 : index
    %c0_33 = arith.constant 0 : index
    %37 = vector.load %arg4[%36, %c0_32, %c0_33] : memref<16x1x32xf32, #tpu.memory_space<vmem>>, vector<1x1x32xf32>
    %38 = vector.shape_cast %37 : vector<1x1x32xf32> to vector<1x32xf32>
    %c3_34 = arith.constant 3 : index
    %c0_35 = arith.constant 0 : index
    %39 = vector.load %arg7[%c3_34, %c0_35] : memref<8x32xf32, #tpu.memory_space<vmem>>, vector<1x32xf32>
    tpu.vector_store %arg7[%c3_34, %c0_35], %38 {strides = array<i32>} : memref<8x32xf32, #tpu.memory_space<vmem>>, vector<1x32xf32>,
    %c4 = arith.constant 4 : index
    %40 = memref.load %arg1[%c4] : memref<8xi32, #tpu.memory_space<smem>>
    %41 = arith.index_cast %40 : i32 to index
    %c0_36 = arith.constant 0 : index
    %c0_37 = arith.constant 0 : index
    %42 = vector.load %arg3[%41, %c0_36, %c0_37] : memref<16x1x32xf32, #tpu.memory_space<vmem>>, vector<1x1x32xf32>
    %43 = vector.shape_cast %42 : vector<1x1x32xf32> to vector<1x32xf32>
    %c4_38 = arith.constant 4 : index
    %c0_39 = arith.constant 0 : index
    %44 = vector.load %arg6[%c4_38, %c0_39] : memref<8x32xf32, #tpu.memory_space<vmem>>, vector<1x32xf32>
    tpu.vector_store %arg6[%c4_38, %c0_39], %43 {strides = array<i32>} : memref<8x32xf32, #tpu.memory_space<vmem>>, vector<1x32xf32>,
    %c4_40 = arith.constant 4 : index
    %45 = memref.load %arg2[%c4_40] : memref<8xi32, #tpu.memory_space<smem>>
    %46 = arith.index_cast %45 : i32 to index
    %c0_41 = arith.constant 0 : index
    %c0_42 = arith.constant 0 : index
    %47 = vector.load %arg4[%46, %c0_41, %c0_42] : memref<16x1x32xf32, #tpu.memory_space<vmem>>, vector<1x1x32xf32>
    %48 = vector.shape_cast %47 : vector<1x1x32xf32> to vector<1x32xf32>
    %c4_43 = arith.constant 4 : index
    %c0_44 = arith.constant 0 : index
    %49 = vector.load %arg7[%c4_43, %c0_44] : memref<8x32xf32, #tpu.memory_space<vmem>>, vector<1x32xf32>
    tpu.vector_store %arg7[%c4_43, %c0_44], %48 {strides = array<i32>} : memref<8x32xf32, #tpu.memory_space<vmem>>, vector<1x32xf32>,
    %c5 = arith.constant 5 : index
    %50 = memref.load %arg1[%c5] : memref<8xi32, #tpu.memory_space<smem>>
    %51 = arith.index_cast %50 : i32 to index
    %c0_45 = arith.constant 0 : index
    %c0_46 = arith.constant 0 : index
    %52 = vector.load %arg3[%51, %c0_45, %c0_46] : memref<16x1x32xf32, #tpu.memory_space<vmem>>, vector<1x1x32xf32>
    %53 = vector.shape_cast %52 : vector<1x1x32xf32> to vector<1x32xf32>
    %c5_47 = arith.constant 5 : index
    %c0_48 = arith.constant 0 : index
    %54 = vector.load %arg6[%c5_47, %c0_48] : memref<8x32xf32, #tpu.memory_space<vmem>>, vector<1x32xf32>
    tpu.vector_store %arg6[%c5_47, %c0_48], %53 {strides = array<i32>} : memref<8x32xf32, #tpu.memory_space<vmem>>, vector<1x32xf32>,
    %c5_49 = arith.constant 5 : index
    %55 = memref.load %arg2[%c5_49] : memref<8xi32, #tpu.memory_space<smem>>
    %56 = arith.index_cast %55 : i32 to index
    %c0_50 = arith.constant 0 : index
    %c0_51 = arith.constant 0 : index
    %57 = vector.load %arg4[%56, %c0_50, %c0_51] : memref<16x1x32xf32, #tpu.memory_space<vmem>>, vector<1x1x32xf32>
    %58 = vector.shape_cast %57 : vector<1x1x32xf32> to vector<1x32xf32>
    %c5_52 = arith.constant 5 : index
    %c0_53 = arith.constant 0 : index
    %59 = vector.load %arg7[%c5_52, %c0_53] : memref<8x32xf32, #tpu.memory_space<vmem>>, vector<1x32xf32>
    tpu.vector_store %arg7[%c5_52, %c0_53], %58 {strides = array<i32>} : memref<8x32xf32, #tpu.memory_space<vmem>>, vector<1x32xf32>,
    %c6 = arith.constant 6 : index
    %60 = memref.load %arg1[%c6] : memref<8xi32, #tpu.memory_space<smem>>
    %61 = arith.index_cast %60 : i32 to index
    %c0_54 = arith.constant 0 : index
    %c0_55 = arith.constant 0 : index
    %62 = vector.load %arg3[%61, %c0_54, %c0_55] : memref<16x1x32xf32, #tpu.memory_space<vmem>>, vector<1x1x32xf32>
    %63 = vector.shape_cast %62 : vector<1x1x32xf32> to vector<1x32xf32>
    %c6_56 = arith.constant 6 : index
    %c0_57 = arith.constant 0 : index
    %64 = vector.load %arg6[%c6_56, %c0_57] : memref<8x32xf32, #tpu.memory_space<vmem>>, vector<1x32xf32>
    tpu.vector_store %arg6[%c6_56, %c0_57], %63 {strides = array<i32>} : memref<8x32xf32, #tpu.memory_space<vmem>>, vector<1x32xf32>,
    %c6_58 = arith.constant 6 : index
    %65 = memref.load %arg2[%c6_58] : memref<8xi32, #tpu.memory_space<smem>>
    %66 = arith.index_cast %65 : i32 to index
    %c0_59 = arith.constant 0 : index
    %c0_60 = arith.constant 0 : index
    %67 = vector.load %arg4[%66, %c0_59, %c0_60] : memref<16x1x32xf32, #tpu.memory_space<vmem>>, vector<1x1x32xf32>
    %68 = vector.shape_cast %67 : vector<1x1x32xf32> to vector<1x32xf32>
    %c6_61 = arith.constant 6 : index
    %c0_62 = arith.constant 0 : index
    %69 = vector.load %arg7[%c6_61, %c0_62] : memref<8x32xf32, #tpu.memory_space<vmem>>, vector<1x32xf32>
    tpu.vector_store %arg7[%c6_61, %c0_62], %68 {strides = array<i32>} : memref<8x32xf32, #tpu.memory_space<vmem>>, vector<1x32xf32>,
    %c7 = arith.constant 7 : index
    %70 = memref.load %arg1[%c7] : memref<8xi32, #tpu.memory_space<smem>>
    %71 = arith.index_cast %70 : i32 to index
    %c0_63 = arith.constant 0 : index
    %c0_64 = arith.constant 0 : index
    %72 = vector.load %arg3[%71, %c0_63, %c0_64] : memref<16x1x32xf32, #tpu.memory_space<vmem>>, vector<1x1x32xf32>
    %73 = vector.shape_cast %72 : vector<1x1x32xf32> to vector<1x32xf32>
    %c7_65 = arith.constant 7 : index
    %c0_66 = arith.constant 0 : index
    %74 = vector.load %arg6[%c7_65, %c0_66] : memref<8x32xf32, #tpu.memory_space<vmem>>, vector<1x32xf32>
    tpu.vector_store %arg6[%c7_65, %c0_66], %73 {strides = array<i32>} : memref<8x32xf32, #tpu.memory_space<vmem>>, vector<1x32xf32>,
    %c7_67 = arith.constant 7 : index
    %75 = memref.load %arg2[%c7_67] : memref<8xi32, #tpu.memory_space<smem>>
    %76 = arith.index_cast %75 : i32 to index
    %c0_68 = arith.constant 0 : index
    %c0_69 = arith.constant 0 : index
    %77 = vector.load %arg4[%76, %c0_68, %c0_69] : memref<16x1x32xf32, #tpu.memory_space<vmem>>, vector<1x1x32xf32>
    %78 = vector.shape_cast %77 : vector<1x1x32xf32> to vector<1x32xf32>
    %c7_70 = arith.constant 7 : index
    %c0_71 = arith.constant 0 : index
    %79 = vector.load %arg7[%c7_70, %c0_71] : memref<8x32xf32, #tpu.memory_space<vmem>>, vector<1x32xf32>
    tpu.vector_store %arg7[%c7_70, %c0_71], %78 {strides = array<i32>} : memref<8x32xf32, #tpu.memory_space<vmem>>, vector<1x32xf32>,
    %c0_72 = arith.constant 0 : index
    %c0_73 = arith.constant 0 : index
    %80 = vector.load %arg6[%c0_72, %c0_73] : memref<8x32xf32, #tpu.memory_space<vmem>>, vector<8x32xf32>
    %c0_74 = arith.constant 0 : index
    %c0_75 = arith.constant 0 : index
    %81 = vector.load %arg7[%c0_74, %c0_75] : memref<8x32xf32, #tpu.memory_space<vmem>>, vector<8x32xf32>
    %82 = arith.mulf %80, %81 : vector<8x32xf32>
    %cst = arith.constant dense<0.000000e+00> : vector<8xf32>
    %83 = vector.multi_reduction <add>, %82, %cst [1] : vector<8x32xf32> to vector<8xf32>
    %84 = vector.shape_cast %83 : vector<8xf32> to vector<8x1xf32>
    %c0_76 = arith.constant 0 : index
    %c0_77 = arith.constant 0 : index
    %85 = vector.load %arg5[%c0_76, %c0_77] : memref<8x1xf32, #tpu.memory_space<vmem>>, vector<8x1xf32>
    tpu.vector_store %arg5[%c0_76, %c0_77], %84 {strides = array<i32>} : memref<8x1xf32, #tpu.memory_space<vmem>>, vector<8x1xf32>,
    return
  }
  func.func @transform_0(%arg0: i32, %arg1: memref<8xi32, #tpu.memory_space<smem>>, %arg2: memref<8xi32, #tpu.memory_space<smem>>) -> (i32, i32, i32) {
    %c0_i32 = arith.constant 0 : i32
    %c0_i32_0 = arith.constant 0 : i32
    %c0_i32_1 = arith.constant 0 : i32
    %c0_i32_2 = arith.constant 0 : i32
    return %c0_i32, %c0_i32_0, %c0_i32_1 : i32, i32, i32
  }
  func.func @transform_1(%arg0: i32, %arg1: memref<8xi32, #tpu.memory_space<smem>>, %arg2: memref<8xi32, #tpu.memory_space<smem>>) -> (i32, i32, i32) {
    %c0_i32 = arith.constant 0 : i32
    %c0_i32_0 = arith.constant 0 : i32
    %c0_i32_1 = arith.constant 0 : i32
    %c0_i32_2 = arith.constant 0 : i32
    return %c0_i32, %c0_i32_0, %c0_i32_1 : i32, i32, i32
  }
  func.func @transform_2(%arg0: i32, %arg1: memref<8xi32, #tpu.memory_space<smem>>, %arg2: memref<8xi32, #tpu.memory_space<smem>>) -> (i32, i32) {
    %c0_i32 = arith.constant 0 : i32
    %c0_i32_0 = arith.constant 0 : i32
    %c0_i32_1 = arith.constant 0 : i32
    return %c0_i32, %c0_i32_0 : i32, i32
  }
}

</mosaic_0001>

<bundles_post_ra>
// kernel: forward.1
= control target key start
LH: loop header
LB: loop body
LE: loop exit
PB: predicated region body
PF: predicated region fallthrough
CT: control target
= control target key end

     0   :  { %s338_s0 = inlined_call_operand.hbm [shape: s32[8], index: 0, kind: input, shape index: {}]   ;;  %s339_s2 = inlined_call_operand.hbm [shape: f32[16,1,32], index: 2, kind: input, shape index: {}]   ;;  %s340_s3 = inlined_call_operand.hbm [shape: f32[16,1,32], index: 3, kind: input, shape index: {}]   ;;  %s341_s4 = inlined_call_operand.vmem [shape: f32[8,1], index: 4, kind: output, shape index: {}]   ;;  %s342_s1 = inlined_call_operand.vmem [shape: s32[8], index: 1, kind: input, shape index: {}]  }
   0x1   :  { %s165_s17 = scalar_lea.hbm %s338_s0, 16 }
   0x2   :  { %p166_p0 = scmp.ne.s32.totalorder %s338_s0, %s165_s17  ;;  %p169_p1 = scmp.lt.u32.totalorder %s165_s17, %s338_s0 }
   0x4   :  { %p171_p2 = pnand %p169_p1, %p166_p0 }
   0x6   :  { %174 = shalt.err (!%p171_p2)  }
   0x7   :  { %s237_s22 = smov [#allocation5]   ;;  %s11_s27 = sshll.u32 %s342_s1, 4  ;;  %s12_s27 = int_to_ptr.vmem [resolvable:$true] %s11_s27 }
   0x8   :  { %10 = dma.hbm_to_smem %s338_s0, 16, %s237_s22, [#allocation4] }
   0x9   :  { %s175_s28 = scalar_lea.vmem %s12_s27, 16  ;;  %p180_p4 = scmp.lt.s32.totalorder %s12_s27, %s12_s27 }
   0xa   :  { %p176_p3 = scmp.ne.s32.totalorder %s12_s27, %s175_s28  ;;  %p181_p5 = scmp.lt.s32.totalorder %s175_s28, %s175_s28 }
   0xc   :  { %p182_p6 = por %p181_p5, %p180_p4 }
   0xe   :  { %p183_p7 = pnand %p182_p6, %p176_p3 }
  0x10   :  { %186 = shalt.err (!%p183_p7)  }
  0x11   :  { %s238_s29 = smov [#allocation6]  }
  0x12   :  { %14 = dma.vmem_to_smem %s12_s27, 16, %s238_s29, [#allocation4] }
  0x13   :  { %231 = dma.done.wait [#allocation4], 32 }
  0x14   :  { %232 = vsyncadd [#allocation4], 4294967264 }
  0x15   :  { %16 = sfence }
  0x16   :  { %17 = vsyncpa [#allocation8], 0 }
  0x17   :  { %18 = vsyncpa [#allocation10], 0  ;;  %s239_s0 = smov [#allocation7]   ;;  %s187_s6 = scalar_lea.hbm %s339_s2, 256 }
  0x18   :  { %s24_s30 = sshll.u32 %s239_s0, 4  ;;  %p188_p8 = scmp.ne.s32.totalorder %s339_s2, %s187_s6  ;;  %s25_s30 = int_to_ptr.vmem [resolvable:$true] %s24_s30 }
  0x19   :  { %p191_p9 = scmp.lt.u32.totalorder %s187_s6, %s339_s2 }
  0x1b   :  { %p193_p10 = pnand %p191_p9, %p188_p8 }
  0x1d   :  { %196 = shalt.err (!%p193_p10)
}
  0x1e   :  { %s197_s11 = scalar_lea.vmem %s25_s30, 256  ;;  %p202_p12 = scmp.lt.s32.totalorder %s25_s30, %s25_s30 }
  0x1f   :  { %p198_p11 = scmp.ne.s32.totalorder %s25_s30, %s197_s11  ;;  %p203_p13 = scmp.lt.s32.totalorder %s197_s11, %s197_s11 }
  0x21   :  { %p204_p0 = por %p203_p13, %p202_p12 }
  0x23   :  { %p205_p1 = pnand %p204_p0, %p198_p11 }
  0x25   :  { %208 = shalt.err (!%p205_p1)
}
  0x26   :  { %s240_s12 = smov 16   ;;  %s241_s13 = smov 1  }
  0x27   :  { %30 = dma.hbm_to_vmem [thread:$0]  %s339_s2, 256, %s25_s30, [#allocation8], %s240_s12, %s240_s12, %s241_s13  }
  0x28   :  { %s242_s16 = smov [#allocation9]   ;;  %s209_s20 = scalar_lea.hbm %s340_s3, 256 }
  0x29   :  { %s36_s17 = sshll.u32 %s242_s16, 4  ;;  %p210_p2 = scmp.ne.s32.totalorder %s340_s3, %s209_s20  ;;  %s37_s17 = int_to_ptr.vmem [resolvable:$true] %s36_s17 }
  0x2a   :  { %p213_p3 = scmp.lt.u32.totalorder %s209_s20, %s340_s3 }
  0x2c   :  { %p215_p4 = pnand %p213_p3, %p210_p2 }
  0x2e   :  { %218 = shalt.err (!%p215_p4)
}
  0x2f   :  { %s219_s25 = scalar_lea.vmem %s37_s17, 256  ;;  %p224_p6 = scmp.lt.s32.totalorder %s37_s17, %s37_s17 }
  0x30   :  { %p220_p5 = scmp.ne.s32.totalorder %s37_s17, %s219_s25  ;;  %p225_p7 = scmp.lt.s32.totalorder %s219_s25, %s219_s25 }
  0x32   :  { %p226_p8 = por %p225_p7, %p224_p6 }
  0x34   :  { %p227_p9 = pnand %p226_p8, %p220_p5 }
  0x36   :  { %230 = shalt.err (!%p227_p9)
}
  0x37   :  { %42 = dma.hbm_to_vmem [thread:$0]  %s340_s3, 256, %s37_s17, [#allocation10], %s240_s12, %s240_s12, %s241_s13  }
  0x38   :  { %233 = dma.done.wait [#allocation8], 256  }
  0x39   :  { %234 = vsyncadd [#allocation8], 4294967040 }
  0x3a   :  { %235 = dma.done.wait [#allocation10], 256  }
  0x3b   :  { %236 = vsyncadd [#allocation10], 4294967040  ;;  %s49_s27 = sld [smem:[#allocation5]]  ;;  %s145_s29 = sld [smem:[#allocation5 + $0x1]]  ;;  %vm52_vm0 = vcmask 253952   ;;  %vm117_vm1 = vcmask 261120  }
  0x3c   :  { %s54_s28 = sld [smem:[#allocation6]]  ;;  %s146_s0 = sld [smem:[#allocation6 + $0x1]]  ;;  %vm121_vm2 = vcmask 7168  }
  0x3d   :  { %s147_s30 = sld [smem:[#allocation5 + $0x2]]  ;;  %s149_s1 = sld [smem:[#allocation5 + $0x3]] }
  0x3e   :  { %s148_s5 = sld [smem:[#allocation6 + $0x2]]  ;;  %s150_s6 = sld [smem:[#allocation6 + $0x3]] }
  0x3f   :  { %s307_s7 = sld [smem:[#allocation5 + $0x4]]  ;;  %s311_s9 = sld [smem:[#allocation5 + $0x5]] }
  0x40   :  { %s309_s8 = sld [smem:[#allocation6 + $0x4]]  ;;  %s313_s3 = sld [smem:[#allocation6 + $0x5]] }
  0x41   :  { %s50_s10 = scalar_lea.vmem [#allocation7], %s49_s27  ;;  %s59_s12 = scalar_lea.vmem [#allocation7], %s145_s29 }
  0x42   :  { %v51_v0 = vld [vmem:[%s50_s10] sm:$0x1]  ;;  %s55_s11 = scalar_lea.vmem [#allocation9], %s54_s28  ;;  %s63_s13 = scalar_lea.vmem [#allocation9], %s146_s0 }
  0x43   :  { %v56_v1 = vld [vmem:[%s55_s11] sm:$0x1]  ;;  %53 = vst.msk [vmem:[#allocation2] sm:$0x1] %vm52_vm0, %v51_v0  ;;  %s67_s14 = scalar_lea.vmem [#allocation7], %s147_s30  ;;  %s75_s16 = scalar_lea.vmem [#allocation7], %s149_s1 }
  0x44   :  { %57 = vst.msk [vmem:[#allocation3] sm:$0x1] %vm52_vm0, %v56_v1  ;;  %v60_v2 = vld [vmem:[%s59_s12] sm:$0x1]  ;;  %s71_s15 = scalar_lea.vmem [#allocation9], %s148_s5  ;;  %s79_s17 = scalar_lea.vmem [#allocation9], %s150_s6 }
  0x45   :  { %v64_v3 = vld [vmem:[%s63_s13] sm:$0x1]  ;;  %61 = vst.msk [vmem:[#allocation2 + $0x1] sm:$0x1] %vm52_vm0, %v60_v2  ;;  %s83_s18 = scalar_lea.vmem [#allocation7], %s307_s7  ;;  %s91_s20 = scalar_lea.vmem [#allocation7], %s311_s9 }
  0x46   :  { %65 = vst.msk [vmem:[#allocation3 + $0x1] sm:$0x1] %vm52_vm0, %v64_v3  ;;  %v68_v4 = vld [vmem:[%s67_s14] sm:$0x1]  ;;  %s87_s19 = scalar_lea.vmem [#allocation9], %s309_s8  ;;  %s95_s21 = scalar_lea.vmem [#allocation9], %s313_s3 }
  0x47   :  { %v72_v5 = vld [vmem:[%s71_s15] sm:$0x1]  ;;  %69 = vst.msk [vmem:[#allocation2 + $0x2] sm:$0x1] %vm52_vm0, %v68_v4  ;;  %s155_s22 = sld [smem:[#allocation5 + $0x6]]  ;;  %s157_s24 = sld [smem:[#allocation5 + $0x7]] }
  0x48   :  { %73 = vst.msk [vmem:[#allocation3 + $0x2] sm:$0x1] %vm52_vm0, %v72_v5  ;;  %v76_v6 = vld [vmem:[%s75_s16] sm:$0x1]  ;;  %s156_s23 = sld [smem:[#allocation6 + $0x6]]  ;;  %s158_s25 = sld [smem:[#allocation6 + $0x7]] }
  0x49   :  { %v80_v7 = vld [vmem:[%s79_s17] sm:$0x1]  ;;  %77 = vst.msk [vmem:[#allocation2 + $0x3] sm:$0x1] %vm52_vm0, %v76_v6 }
  0x4a   :  { %81 = vst.msk [vmem:[#allocation3 + $0x3] sm:$0x1] %vm52_vm0, %v80_v7  ;;  %v84_v8 = vld [vmem:[%s83_s18] sm:$0x1] }
  0x4b   :  { %v88_v9 = vld [vmem:[%s87_s19] sm:$0x1]  ;;  %85 = vst.msk [vmem:[#allocation2 + $0x4] sm:$0x1] %vm52_vm0, %v84_v8 }
  0x4c   :  { %89 = vst.msk [vmem:[#allocation3 + $0x4] sm:$0x1] %vm52_vm0, %v88_v9  ;;  %v92_v10 = vld [vmem:[%s91_s20] sm:$0x1] }
  0x4d   :  { %v96_v11 = vld [vmem:[%s95_s21] sm:$0x1]  ;;  %93 = vst.msk [vmem:[#allocation2 + $0x5] sm:$0x1] %vm52_vm0, %v92_v10  ;;  %s99_s2 = scalar_lea.vmem [#allocation7], %s155_s22  ;;  %s107_s27 = scalar_lea.vmem [#allocation7], %s157_s24 }
  0x4e   :  { %97 = vst.msk [vmem:[#allocation3 + $0x5] sm:$0x1] %vm52_vm0, %v96_v11  ;;  %v100_v12 = vld [vmem:[%s99_s2] sm:$0x1]  ;;  %s103_s26 = scalar_lea.vmem [#allocation9], %s156_s23  ;;  %s111_s28 = scalar_lea.vmem [#allocation9], %s158_s25 }
  0x4f   :  { %101 = vst.msk [vmem:[#allocation2 + $0x6] sm:$0x1] %vm52_vm0, %v100_v12  ;;  %v104_v13 = vld [vmem:[%s103_s26] sm:$0x1] }
  0x50   :  { %v108_v14 = vld [vmem:[%s107_s27] sm:$0x1]  ;;  %105 = vst.msk [vmem:[#allocation3 + $0x6] sm:$0x1] %vm52_vm0, %v104_v13 }
  0x51   :  { %109 = vst.msk [vmem:[#allocation2 + $0x7] sm:$0x1] %vm52_vm0, %v108_v14  ;;  %v112_v15 = vld [vmem:[%s111_s28] sm:$0x1] }
  0x52   :  { %113 = vst.msk [vmem:[#allocation3 + $0x7] sm:$0x1] %vm52_vm0, %v112_v15 }
  0x58   :  { %v114_v16 = vld [vmem:[#allocation2] sm:$0xff] }
  0x59   :  { %v115_v17 = vld [vmem:[#allocation3] sm:$0xff] }
  0x5a   :  { %v116_v18 = vmul.f32 %v115_v17, %v114_v16 }
  0x5c   :  { %v118_v19 = vsel %vm117_vm1, %v116_v18, 0.0 }
  0x5d   :  { %119 = vadd.xlane.f32.xlu0 %v118_v19 }
  0xea   :  { %v120_v20 = vpop.xlane.xlu0 %119 }
  0xeb   :  { %122 = vst.msk [vmem:[%s341_s4] sm:$0xff] %vm121_vm2, %v120_v20 }
  0xec   :  { %127 = vsyncpa [#allocation8], 1 }
  0xed   :  { %128 = vsyncpa [#allocation10], 1 }

</bundles_post_ra>
